<compile_context>
chip_gen: v5e
topology: v5e:2x2
jax: 0.10.0
libtpu: 0.0.40
codegen_flags: <defaults>
</compile_context>

<pallas_src>
import functools

import jax
import jax.numpy as jnp
from jax.experimental import pallas as pl
from jax.experimental.pallas import tpu as pltpu


def _round_up(v, m):
    return -(-v // m) * m


# ----------------------------------------------------------------------------- kernel
def _ipnn_kernel(d_pad, apply_sigmoid,
                 x_ref, wenc_ref, benc_ref, w1_ref, b1_ref,
                 w2_ref, b2_ref, w3_ref, b3_ref,
                 out_ref):
    cdt = wenc_ref.dtype                       # matmul compute dtype (f32 or bf16)
    x = x_ref[...]                             # [TM, Ktot], already compute dtype

    # Fused encoder: all 6 Linears in one MXU pass.  f32 accumulation, f32 bias.
    enc = jnp.dot(x, wenc_ref[...], preferred_element_type=jnp.float32) + benc_ref[...]

    # Pairwise interactions + torch.cat, as one aligned elementwise multiply.
    allv = enc[:, :d_pad] * enc[:, d_pad:]     # [TM, Dp]   (cols >= 3F+3 are exact 0)

    # Decoder layer 1 (K padded to a 128 multiple) + Tanh.
    h1 = jnp.tanh(jnp.dot(allv.astype(cdt), w1_ref[...],
                          preferred_element_type=jnp.float32) + b1_ref[...])

    # Decoder layer 2 + Tanh.
    h2 = jnp.tanh(jnp.dot(h1.astype(cdt), w2_ref[...],
                          preferred_element_type=jnp.float32) + b2_ref[...])

    # Final Linear(H2, 1) computed transposed so the result is lane-dense:
    # w3_blk [8, H2p] (rows 1..7 zero) contracted with h2 [TM, H2p] -> [8, TM].
    xo = jax.lax.dot_general(
        w3_ref[...], h2.astype(cdt),
        dimension_numbers=(((1,), (1,)), ((), ())),
        preferred_element_type=jnp.float32)
    xo = xo[0:1, :] + b3_ref[...]              # [1, TM]

    if apply_sigmoid:
        xo = jax.nn.sigmoid(xo)
    out_ref[...] = xo[None].astype(out_ref.dtype)   # [1, 1, TM]


# ----------------------------------------------------------------------------- params
def _linear_init(key, fan_in, fan_out):
    """Deterministic torch-style init: U(-1/sqrt(fan_in), 1/sqrt(fan_in))."""
    kw, kb = jax.random.split(key)
    bound = 1.0 / jnp.sqrt(float(fan_in))
    w = jax.random.uniform(kw, (fan_in, fan_out), jnp.float32, -bound, bound)
    b = jax.random.uniform(kb, (1, fan_out), jnp.float32, -bound, bound)
    return w, b


def init_ipnn_params(key, num_user_compliment, num_business_city,
                     num_business_category, num_features):
    """Per-layer weights exactly mirroring the PyTorch module (pre-transposed)."""
    num_decoder = num_features * 3 + 3
    h1 = int(round(num_decoder / 2, 0))
    h2 = int(round(num_decoder / 4, 0))
    keys = jax.random.split(key, 9)
    p = {}
    p["w_uc"], p["b_uc"] = _linear_init(keys[0], num_user_compliment, num_features)
    p["w_city"], p["b_city"] = _linear_init(keys[1], num_business_city, num_features)
    p["w_cat"], p["b_cat"] = _linear_init(keys[2], num_business_category, num_features)
    p["w_ucw"], p["b_ucw"] = _linear_init(keys[3], num_user_compliment, 1)
    p["w_cityw"], p["b_cityw"] = _linear_init(keys[4], num_business_city, 1)
    p["w_catw"], p["b_catw"] = _linear_init(keys[5], num_business_category, 1)
    p["w1"], p["b1"] = _linear_init(keys[6], num_decoder, h1)
    p["w2"], p["b2"] = _linear_init(keys[7], h1, h2)
    p["w3"], p["b3"] = _linear_init(keys[8], h2, 1)
    p["num_features"] = num_features
    return p


def pack_ipnn_params(raw, num_features, compute_dtype=jnp.bfloat16):
    """Build the fused weight slabs (plain-JAX glue, done once)."""
    F = num_features
    D = 3 * F + 3                               # num_decoder
    Dp = 128 * ((D + 127) // 128)               # pad interaction width to lane tiles
    Kuc = raw["w_uc"].shape[0]
    Kci = raw["w_city"].shape[0]
    Kca = raw["w_cat"].shape[0]
    Ktot = Kuc + Kci + Kca
    H1 = raw["w1"].shape[1]
    H2 = raw["w2"].shape[1]
    H1p = _round_up(H1, 32)                     # 50 -> 64
    H2p = _round_up(H2, 32)                     # 25 -> 32

    r_uc = slice(0, Kuc)
    r_ci = slice(Kuc, Kuc + Kci)
    r_ca = slice(Kuc + Kci, Ktot)

    w_enc = jnp.zeros((Ktot, 2 * Dp), jnp.float32)
    b_enc = jnp.zeros((1, 2 * Dp), jnp.float32)

    # Left block: [e_uc | e_city | e_cat | wt_uc | wt_city | wt_cat | 0pad]
    w_enc = w_enc.at[r_uc, 0:F].set(raw["w_uc"])
    w_enc = w_enc.at[r_ci, F:2 * F].set(raw["w_city"])
    w_enc = w_enc.at[r_ca, 2 * F:3 * F].set(raw["w_cat"])
    w_enc = w_enc.at[r_uc, 3 * F:3 * F + 1].set(raw["w_ucw"])
    w_enc = w_enc.at[r_ci, 3 * F + 1:3 * F + 2].set(raw["w_cityw"])
    w_enc = w_enc.at[r_ca, 3 * F + 2:3 * F + 3].set(raw["w_catw"])
    b_enc = b_enc.at[0, 0:F].set(raw["b_uc"][0])
    b_enc = b_enc.at[0, F:2 * F].set(raw["b_city"][0])
    b_enc = b_enc.at[0, 2 * F:3 * F].set(raw["b_cat"][0])
    b_enc = b_enc.at[0, 3 * F:3 * F + 1].set(raw["b_ucw"][0])
    b_enc = b_enc.at[0, 3 * F + 1:3 * F + 2].set(raw["b_cityw"][0])
    b_enc = b_enc.at[0, 3 * F + 2:3 * F + 3].set(raw["b_catw"][0])

    # Right block: [e_city | e_cat | e_uc | 1 | 1 | 1 | 0pad]
    o = Dp
    w_enc = w_enc.at[r_ci, o + 0:o + F].set(raw["w_city"])
    w_enc = w_enc.at[r_ca, o + F:o + 2 * F].set(raw["w_cat"])
    w_enc = w_enc.at[r_uc, o + 2 * F:o + 3 * F].set(raw["w_uc"])
    b_enc = b_enc.at[0, o + 0:o + F].set(raw["b_city"][0])
    b_enc = b_enc.at[0, o + F:o + 2 * F].set(raw["b_cat"][0])
    b_enc = b_enc.at[0, o + 2 * F:o + 3 * F].set(raw["b_uc"][0])
    b_enc = b_enc.at[0, o + 3 * F:o + 3 * F + 3].set(1.0)

    # Decoder layer-1 weight: permute rows to match allv = [p_uc_city | p_city_cat |
    # p_uc_cat | wt_uc | wt_city | wt_cat], zero-pad K to Dp and N to H1p.
    w1 = raw["w1"]
    w1_perm = jnp.concatenate(
        [w1[0:F], w1[2 * F:3 * F], w1[F:2 * F], w1[3 * F:3 * F + 3]], axis=0)
    w1_pad = jnp.zeros((Dp, H1p), jnp.float32).at[0:D, 0:H1].set(w1_perm)
    b1_pad = jnp.zeros((1, H1p), jnp.float32).at[0, 0:H1].set(raw["b1"][0])

    # Decoder layer-2 weight: zero-pad to [H1p, H2p]  (padded h1 cols are exactly 0).
    w2_pad = jnp.zeros((H1p, H2p), jnp.float32).at[0:H1, 0:H2].set(raw["w2"])
    b2_pad = jnp.zeros((1, H2p), jnp.float32).at[0, 0:H2].set(raw["b2"][0])

    # Final weight as an 8-row block (row 0 real, rows 1..7 zero) for the
    # transposed lane-dense matmul in the kernel.
    w3_blk = jnp.zeros((8, H2p), jnp.float32).at[0, 0:H2].set(raw["w3"][:, 0])

    cd = compute_dtype
    return {
        "d_pad": Dp,
        "ktot": Ktot,
        "x_dtype": cd,
        "w_enc": w_enc.astype(cd), "b_enc": b_enc,
        "w1": w1_pad.astype(cd), "b1": b1_pad,
        "w2": w2_pad.astype(cd), "b2": b2_pad,
        "w3_blk": w3_blk.astype(cd), "b3": raw["b3"],
    }


# ----------------------------------------------------------------------------- forward
def ipnn_forward(packed, ucf, cityf, catf, methods="classification",
                 block_rows=2048, vmem_limit_bytes=None):
    B = ucf.shape[0]
    apply_sigmoid = (methods != "regression")
    d_pad = packed["d_pad"]

    # Single input slab in the compute dtype (bf16 halves the dominant HBM stream).
    x = jnp.concatenate([ucf, cityf, catf], axis=-1).astype(packed["x_dtype"])
    ktot = x.shape[1]

    block_rows = max(16, _round_up(int(block_rows), 16))
    if B > block_rows:
        tm = block_rows                          # multiple of 16 (f32 & bf16 tiles OK)
    elif B >= 512:
        # Split moderate batches into 2 row tiles so v7x megacore uses both TCs.
        tm = _round_up(pl.cdiv(B, 2), 16)
    else:
        tm = B                                   # one tile == full batch (full-dim block)
    bp = _round_up(B, tm)
    nt = bp // tm
    if bp != B:
        x = jnp.pad(x, ((0, bp - B), (0, 0)))

    weight_inputs = (packed["w_enc"], packed["b_enc"], packed["w1"], packed["b1"],
                     packed["w2"], packed["b2"], packed["w3_blk"], packed["b3"])

    def const_spec(a):
        return pl.BlockSpec(a.shape, lambda i: (0,) * a.ndim)

    kernel = functools.partial(_ipnn_kernel, d_pad, apply_sigmoid)

    out = pl.pallas_call(
        kernel,
        out_shape=jax.ShapeDtypeStruct((nt, 1, tm), jnp.float32),   # lane-dense rows
        grid=(nt,),
        in_specs=[pl.BlockSpec((tm, ktot), lambda i: (i, 0))]
                 + [const_spec(a) for a in weight_inputs],
        out_specs=pl.BlockSpec((1, 1, tm), lambda i: (i, 0, 0)),
        compiler_params=pltpu.CompilerParams(
            dimension_semantics=("parallel",),
            vmem_limit_bytes=vmem_limit_bytes),
    )(x, *weight_inputs)
    return out.reshape(bp, 1)[:B]


# ----------------------------------------------------------------------------- reference
def ipnn_reference(raw, ucf, cityf, catf, methods="classification"):
    """Pure-JAX reference mirroring the PyTorch forward exactly (with torch.cat)."""
    hp = jax.lax.Precision.HIGHEST
    dot = lambda a, b: jnp.dot(a, b, precision=hp)
    e_uc = dot(ucf, raw["w_uc"]) + raw["b_uc"]
    e_city = dot(cityf, raw["w_city"]) + raw["b_city"]
    e_cat = dot(catf, raw["w_cat"]) + raw["b_cat"]
    wt_uc = dot(ucf, raw["w_ucw"]) + raw["b_ucw"]
    wt_city = dot(cityf, raw["w_cityw"]) + raw["b_cityw"]
    wt_cat = dot(catf, raw["w_catw"]) + raw["b_catw"]
    allv = jnp.concatenate(
        [e_uc * e_city, e_uc * e_cat, e_city * e_cat, wt_uc, wt_city, wt_cat], axis=-1)
    h = jnp.tanh(dot(allv, raw["w1"]) + raw["b1"])
    h = jnp.tanh(dot(h, raw["w2"]) + raw["b2"])
    x = dot(h, raw["w3"]) + raw["b3"]
    return x if methods == "regression" else jax.nn.sigmoid(x)


# ----------------------------------------------------------------------------- main
if __name__ == "__main__":
    B = 8
    num_user_compliment = 16
    num_business_city = 12
    num_business_category = 20
    num_features = 32
    methods = "classification"   # anything != "regression" -> sigmoid output

    key = jax.random.PRNGKey(0)
    k_ucf, k_city, k_cat, k_params, k_big = jax.random.split(key, 5)
    ucf = jax.random.normal(k_ucf, (B, num_user_compliment), jnp.float32)
    cityf = jax.random.normal(k_city, (B, num_business_city), jnp.float32)
    catf = jax.random.normal(k_cat, (B, num_business_category), jnp.float32)

    raw = init_ipnn_params(k_params, num_user_compliment, num_business_city,
                           num_business_category, num_features)
    ref = jax.block_until_ready(ipnn_reference(raw, ucf, cityf, catf, methods))

    # 1) f32-matmul path: tight check (fusion/permutation/padding is exact math).
    packed_f32 = pack_ipnn_params(raw, num_features, compute_dtype=jnp.float32)
    out_f32 = jax.block_until_ready(ipnn_forward(packed_f32, ucf, cityf, catf, methods))
    assert out_f32.shape == (B, 1), out_f32.shape
    assert jnp.allclose(out_f32, ref, atol=1e-4, rtol=1e-4), (out_f32, ref)

    # 2) bf16-MXU fast path (v6e/v7x): f32 accumulation, looser tolerance.
    packed_bf16 = pack_ipnn_params(raw, num_features, compute_dtype=jnp.bfloat16)
    out_bf16 = jax.block_until_ready(ipnn_forward(packed_bf16, ucf, cityf, catf, methods))
    assert out_bf16.shape == (B, 1), out_bf16.shape
    assert jnp.allclose(out_bf16, ref, atol=2e-2, rtol=2e-2), (out_bf16, ref)

    # 3) Moderate batch: exercises the 2-tile megacore split + row padding.
    Bb = 1000
    kb1, kb2, kb3 = jax.random.split(k_big, 3)
    ucf_b = jax.random.normal(kb1, (Bb, num_user_compliment), jnp.float32)
    cityf_b = jax.random.normal(kb2, (Bb, num_business_city), jnp.float32)
    catf_b = jax.random.normal(kb3, (Bb, num_business_category), jnp.float32)
    ref_b = ipnn_reference(raw, ucf_b, cityf_b, catf_b, methods)
    out_b = jax.block_until_ready(
        ipnn_forward(packed_f32, ucf_b, cityf_b, catf_b, methods))
    assert out_b.shape == (Bb, 1), out_b.shape
    assert jnp.allclose(out_b, ref_b, atol=1e-4, rtol=1e-4), (out_b, ref_b)

    # 4) Large batch: exercises the multi-step batch grid (B > block_rows).
    Bc = 5000
    kc1, kc2, kc3 = jax.random.split(kb1, 3)
    ucf_c = jax.random.normal(kc1, (Bc, num_user_compliment), jnp.float32)
    cityf_c = jax.random.normal(kc2, (Bc, num_business_city), jnp.float32)
    catf_c = jax.random.normal(kc3, (Bc, num_business_category), jnp.float32)
    ref_c = ipnn_reference(raw, ucf_c, cityf_c, catf_c, methods)
    out_c = jax.block_until_ready(
        ipnn_forward(packed_f32, ucf_c, cityf_c, catf_c, methods, block_rows=2048))
    assert out_c.shape == (Bc, 1), out_c.shape
    assert jnp.allclose(out_c, ref_c, atol=1e-4, rtol=1e-4), (out_c, ref_c)

    print("KERNEL_OK")
</pallas_src>

<mosaic_0001>
module attributes {stable_mosaic.version = 11 : i64} {
  func.func @_ipnn_kernel(%arg0: i32, %arg1: memref<8x48xf32, #tpu.memory_space<vmem>>, %arg2: memref<48x256xf32, #tpu.memory_space<vmem>>, %arg3: memref<1x256xf32, #tpu.memory_space<vmem>>, %arg4: memref<128x64xf32, #tpu.memory_space<vmem>>, %arg5: memref<1x64xf32, #tpu.memory_space<vmem>>, %arg6: memref<64x32xf32, #tpu.memory_space<vmem>>, %arg7: memref<1x32xf32, #tpu.memory_space<vmem>>, %arg8: memref<8x32xf32, #tpu.memory_space<vmem>>, %arg9: memref<1x1xf32, #tpu.memory_space<vmem>>, %arg10: memref<1x1x8xf32, #tpu.memory_space<vmem>>) attributes {dimension_semantics = [#tpu.dimension_semantics<parallel>], iteration_bounds = array<i64: 1>, scalar_prefetch = 0 : i64, scratch_operands = 0 : i64, tpu.core_type = #tpu.core_type<tc>, window_params = [{transform_indices = @transform_0, window_bounds = array<i64: 8, 48>}, {pipeline_mode = #tpu.pipeline_mode<synchronous>, transform_indices = @transform_1, window_bounds = array<i64: 48, 256>}, {pipeline_mode = #tpu.pipeline_mode<synchronous>, transform_indices = @transform_2, window_bounds = array<i64: 1, 256>}, {pipeline_mode = #tpu.pipeline_mode<synchronous>, transform_indices = @transform_3, window_bounds = array<i64: 128, 64>}, {pipeline_mode = #tpu.pipeline_mode<synchronous>, transform_indices = @transform_4, window_bounds = array<i64: 1, 64>}, {pipeline_mode = #tpu.pipeline_mode<synchronous>, transform_indices = @transform_5, window_bounds = array<i64: 64, 32>}, {pipeline_mode = #tpu.pipeline_mode<synchronous>, transform_indices = @transform_6, window_bounds = array<i64: 1, 32>}, {pipeline_mode = #tpu.pipeline_mode<synchronous>, transform_indices = @transform_7, window_bounds = array<i64: 8, 32>}, {pipeline_mode = #tpu.pipeline_mode<synchronous>, transform_indices = @transform_8, window_bounds = array<i64: 1, 1>}, {transform_indices = @transform_9, window_bounds = array<i64: 1, 1, 8>}]} {
    %c0 = arith.constant 0 : index
    %c0_0 = arith.constant 0 : index
    %0 = vector.load %arg1[%c0, %c0_0] : memref<8x48xf32, #tpu.memory_space<vmem>>, vector<8x48xf32>
    %c0_1 = arith.constant 0 : index
    %c0_2 = arith.constant 0 : index
    %1 = vector.load %arg2[%c0_1, %c0_2] : memref<48x256xf32, #tpu.memory_space<vmem>>, vector<48x256xf32>
    %cst = arith.constant dense<0.000000e+00> : vector<8x256xf32>
    %2 = tpu.matmul %0, %1, %cst {dimension_numbers = #tpu.dot_dimension_numbers<[1], [0], [0], [1], [0, 0, 1, 1], [], []>} : vector<8x48xf32>, vector<48x256xf32>, vector<8x256xf32> -> vector<8x256xf32>
    %c0_3 = arith.constant 0 : index
    %c0_4 = arith.constant 0 : index
    %3 = vector.load %arg3[%c0_3, %c0_4] : memref<1x256xf32, #tpu.memory_space<vmem>>, vector<1x256xf32>
    %4 = vector.broadcast %3 : vector<1x256xf32> to vector<8x256xf32>
    %5 = arith.addf %2, %4 : vector<8x256xf32>
    %6 = vector.extract_strided_slice %5 {offsets = [0, 0], sizes = [8, 128], strides = [1, 1]} : vector<8x256xf32> to vector<8x128xf32>
    %7 = vector.extract_strided_slice %5 {offsets = [0, 128], sizes = [8, 128], strides = [1, 1]} : vector<8x256xf32> to vector<8x128xf32>
    %8 = arith.mulf %6, %7 : vector<8x128xf32>
    %c0_5 = arith.constant 0 : index
    %c0_6 = arith.constant 0 : index
    %9 = vector.load %arg4[%c0_5, %c0_6] : memref<128x64xf32, #tpu.memory_space<vmem>>, vector<128x64xf32>
    %cst_7 = arith.constant dense<0.000000e+00> : vector<8x64xf32>
    %10 = tpu.matmul %8, %9, %cst_7 {dimension_numbers = #tpu.dot_dimension_numbers<[1], [0], [0], [1], [0, 0, 1, 1], [], []>} : vector<8x128xf32>, vector<128x64xf32>, vector<8x64xf32> -> vector<8x64xf32>
    %c0_8 = arith.constant 0 : index
    %c0_9 = arith.constant 0 : index
    %11 = vector.load %arg5[%c0_8, %c0_9] : memref<1x64xf32, #tpu.memory_space<vmem>>, vector<1x64xf32>
    %12 = vector.broadcast %11 : vector<1x64xf32> to vector<8x64xf32>
    %13 = arith.addf %10, %12 : vector<8x64xf32>
    %14 = math.tanh %13 : vector<8x64xf32>
    %c0_10 = arith.constant 0 : index
    %c0_11 = arith.constant 0 : index
    %15 = vector.load %arg6[%c0_10, %c0_11] : memref<64x32xf32, #tpu.memory_space<vmem>>, vector<64x32xf32>
    %cst_12 = arith.constant dense<0.000000e+00> : vector<8x32xf32>
    %16 = tpu.matmul %14, %15, %cst_12 {dimension_numbers = #tpu.dot_dimension_numbers<[1], [0], [0], [1], [0, 0, 1, 1], [], []>} : vector<8x64xf32>, vector<64x32xf32>, vector<8x32xf32> -> vector<8x32xf32>
    %c0_13 = arith.constant 0 : index
    %c0_14 = arith.constant 0 : index
    %17 = vector.load %arg7[%c0_13, %c0_14] : memref<1x32xf32, #tpu.memory_space<vmem>>, vector<1x32xf32>
    %18 = vector.broadcast %17 : vector<1x32xf32> to vector<8x32xf32>
    %19 = arith.addf %16, %18 : vector<8x32xf32>
    %20 = math.tanh %19 : vector<8x32xf32>
    %c0_15 = arith.constant 0 : index
    %c0_16 = arith.constant 0 : index
    %21 = vector.load %arg8[%c0_15, %c0_16] : memref<8x32xf32, #tpu.memory_space<vmem>>, vector<8x32xf32>
    %cst_17 = arith.constant dense<0.000000e+00> : vector<8x8xf32>
    %22 = tpu.matmul %21, %20, %cst_17 {dimension_numbers = #tpu.dot_dimension_numbers<[1], [1], [0], [0], [0, 0, 1, 0], [], []>} : vector<8x32xf32>, vector<8x32xf32>, vector<8x8xf32> -> vector<8x8xf32>
    %23 = vector.extract_strided_slice %22 {offsets = [0, 0], sizes = [1, 8], strides = [1, 1]} : vector<8x8xf32> to vector<1x8xf32>
    %c0_18 = arith.constant 0 : index
    %c0_19 = arith.constant 0 : index
    %24 = vector.load %arg9[%c0_18, %c0_19] : memref<1x1xf32, #tpu.memory_space<vmem>>, vector<1x1xf32>
    %25 = vector.broadcast %24 : vector<1x1xf32> to vector<1x8xf32>
    %26 = arith.addf %23, %25 : vector<1x8xf32>
    %27 = arith.negf %26 : vector<1x8xf32>
    %28 = math.exp %27 : vector<1x8xf32>
    %cst_20 = arith.constant 1.000000e+00 : f32
    %29 = vector.broadcast %cst_20 : f32 to vector<1x8xf32>
    %30 = arith.addf %29, %28 : vector<1x8xf32>
    %31 = arith.divf %29, %30 : vector<1x8xf32>
    %32 = vector.shape_cast %31 : vector<1x8xf32> to vector<1x1x8xf32>
    %c0_21 = arith.constant 0 : index
    %c0_22 = arith.constant 0 : index
    %c0_23 = arith.constant 0 : index
    %33 = vector.load %arg10[%c0_21, %c0_22, %c0_23] : memref<1x1x8xf32, #tpu.memory_space<vmem>>, vector<1x1x8xf32>
    tpu.vector_store %arg10[%c0_21, %c0_22, %c0_23], %32 {strides = array<i32>} : memref<1x1x8xf32, #tpu.memory_space<vmem>>, vector<1x1x8xf32>,
    return
  }
  func.func @transform_0(%arg0: i32) -> (i32, i32) {
    %c0_i32 = arith.constant 0 : i32
    %c0_i32_0 = arith.constant 0 : i32
    return %arg0, %c0_i32 : i32, i32
  }
  func.func @transform_1(%arg0: i32) -> (i32, i32) {
    %c0_i32 = arith.constant 0 : i32
    %c0_i32_0 = arith.constant 0 : i32
    %c0_i32_1 = arith.constant 0 : i32
    return %c0_i32, %c0_i32_0 : i32, i32
  }
  func.func @transform_2(%arg0: i32) -> (i32, i32) {
    %c0_i32 = arith.constant 0 : i32
    %c0_i32_0 = arith.constant 0 : i32
    %c0_i32_1 = arith.constant 0 : i32
    return %c0_i32, %c0_i32_0 : i32, i32
  }
  func.func @transform_3(%arg0: i32) -> (i32, i32) {
    %c0_i32 = arith.constant 0 : i32
    %c0_i32_0 = arith.constant 0 : i32
    %c0_i32_1 = arith.constant 0 : i32
    return %c0_i32, %c0_i32_0 : i32, i32
  }
  func.func @transform_4(%arg0: i32) -> (i32, i32) {
    %c0_i32 = arith.constant 0 : i32
    %c0_i32_0 = arith.constant 0 : i32
    %c0_i32_1 = arith.constant 0 : i32
    return %c0_i32, %c0_i32_0 : i32, i32
  }
  func.func @transform_5(%arg0: i32) -> (i32, i32) {
    %c0_i32 = arith.constant 0 : i32
    %c0_i32_0 = arith.constant 0 : i32
    %c0_i32_1 = arith.constant 0 : i32
    return %c0_i32, %c0_i32_0 : i32, i32
  }
  func.func @transform_6(%arg0: i32) -> (i32, i32) {
    %c0_i32 = arith.constant 0 : i32
    %c0_i32_0 = arith.constant 0 : i32
    %c0_i32_1 = arith.constant 0 : i32
    return %c0_i32, %c0_i32_0 : i32, i32
  }
  func.func @transform_7(%arg0: i32) -> (i32, i32) {
    %c0_i32 = arith.constant 0 : i32
    %c0_i32_0 = arith.constant 0 : i32
    %c0_i32_1 = arith.constant 0 : i32
    return %c0_i32, %c0_i32_0 : i32, i32
  }
  func.func @transform_8(%arg0: i32) -> (i32, i32) {
    %c0_i32 = arith.constant 0 : i32
    %c0_i32_0 = arith.constant 0 : i32
    %c0_i32_1 = arith.constant 0 : i32
    return %c0_i32, %c0_i32_0 : i32, i32
  }
  func.func @transform_9(%arg0: i32) -> (i32, i32, i32) {
    %c0_i32 = arith.constant 0 : i32
    %c0_i32_0 = arith.constant 0 : i32
    %c0_i32_1 = arith.constant 0 : i32
    return %arg0, %c0_i32, %c0_i32_0 : i32, i32, i32
  }
}

</mosaic_0001>

<bundles_post_ra>
// kernel: tpu_custom_call.1
= control target key start
LH: loop header
LB: loop body
LE: loop exit
PB: predicated region body
PF: predicated region fallthrough
CT: control target
= control target key end

     0   :  { %s476_s0 = inlined_call_operand.vmem [shape: f32[8,48], index: 0, kind: input, shape index: {}]   ;;  %s477_s1 = inlined_call_operand.vmem [shape: f32[48,256], index: 1, kind: input, shape index: {}]   ;;  %s478_s2 = inlined_call_operand.vmem [shape: f32[1,256], index: 2, kind: input, shape index: {}]   ;;  %s479_s3 = inlined_call_operand.vmem [shape: f32[128,64], index: 3, kind: input, shape index: {}]   ;;  %s480_s4 = inlined_call_operand.vmem [shape: f32[1,64], index: 4, kind: input, shape index: {}]   ;;  %s481_s5 = inlined_call_operand.vmem [shape: f32[64,32], index: 5, kind: input, shape index: {}]   ;;  %s482_s6 = inlined_call_operand.vmem [shape: f32[1,32], index: 6, kind: input, shape index: {}]   ;;  %s483_s7 = inlined_call_operand.vmem [shape: f32[8,32], index: 7, kind: input, shape index: {}]   ;;  %s484_s8 = inlined_call_operand.<no memory space> [shape: f32[1,1], index: 8, kind: input, shape index: {}]   ;;  %s485_s9 = inlined_call_operand.hbm [shape: f32[1,1,8], index: 9, kind: output, shape index: {}]  }
   0x1   :  { %v14_v0 = vstv %s484_s8 }
   0x2   :  { %15 = vst [vmem:[#allocation2] sm:$0x1] %v14_v0 }
   0x3   :  { %v46_v1 = vld [vmem:[%s477_s1 + $0x50] sm:$0xff]  ;;  %v47_v2 = vld [vmem:[%s477_s1 + $0x58] sm:$0xff]  ;;  %v44_v3 = vld [vmem:[%s477_s1 + $0x40] sm:$0xff]  ;;  %vm54_vm0 = vcmask 392192  }
   0x4   :  { %68 = vmatpush.msra.mxu0 %v46_v1  ;;  %88 = vmatpush.msra.mxu1 %v47_v2  ;;  %v45_v4 = vld [vmem:[%s477_s1 + $0x48] sm:$0xff]  ;;  %v42_v5 = vld [vmem:[%s477_s1 + $0x30] sm:$0xff]  ;;  %v43_v6 = vld [vmem:[%s477_s1 + $0x38] sm:$0xff] }
   0x5   :  { %v40_v7 = vld [vmem:[%s477_s1 + $0x20] sm:$0xff]  ;;  %v41_v8 = vld [vmem:[%s477_s1 + $0x28] sm:$0xff]  ;;  %v114_v9 = vld [vmem:[%s479_s3 + $0x78] sm:$0xff] }
   0x6   :  { %69 = vmatpush.msra.mxu0 %v44_v3  ;;  %89 = vmatpush.msra.mxu1 %v45_v4  ;;  %v113_v10 = vld [vmem:[%s479_s3 + $0x70] sm:$0xff]  ;;  %v39_v12 = vld [vmem:[%s477_s1 + $0x18] sm:$0xff]  ;;  %v112_v13 = vld [vmem:[%s479_s3 + $0x68] sm:$0xff] }
   0x7   :  { %v38_v11 = vld [vmem:[%s477_s1 + $0x10] sm:$0xff]  ;;  %119 = vmatpush.msra.mxu2 %v114_v9  ;;  %v36_v14 = vld [vmem:[%s477_s1] sm:$0xff]  ;;  %v37_v15 = vld [vmem:[%s477_s1 + $0x8] sm:$0xff] }
   0x8   :  { %70 = vmatpush.msra.mxu0 %v42_v5  ;;  %90 = vmatpush.msra.mxu1 %v43_v6  ;;  %v35_v16 = vld [vmem:[%s476_s0] sm:$0xff] }
   0x9   :  { %120 = vmatpush.msra.mxu2 %v113_v10  ;;  %v111_v17 = vld [vmem:[%s479_s3 + $0x60] sm:$0xff] }
   0xa   :  { %71 = vmatpush.msra.mxu0 %v40_v7  ;;  %91 = vmatpush.msra.mxu1 %v41_v8 }
   0xb   :  { %121 = vmatpush.msra.mxu2 %v112_v13 }
   0xc   :  { %72 = vmatpush.msra.mxu0 %v38_v11  ;;  %92 = vmatpush.msra.mxu1 %v39_v12 }
   0xd   :  { %16 = vsyncpa [#allocation4], 0  ;;  %v110_v18 = vld [vmem:[%s479_s3 + $0x58] sm:$0xff]  ;;  %122 = vmatpush.msra.mxu2 %v111_v17  ;;  %v109_v19 = vld [vmem:[%s479_s3 + $0x50] sm:$0xff]  ;;  %vm152_vm1 = vcmask 523264   ;;  %v295_v51 = vmov 0  }
   0xe   :  { %73 = vmatpush.msra.mxu0 %v36_v14  ;;  %93 = vmatpush.msra.mxu1 %v37_v15  ;;  %v108_v20 = vld [vmem:[%s479_s3 + $0x48] sm:$0xff]  ;;  %v107_v21 = vld [vmem:[%s479_s3 + $0x40] sm:$0xff]  ;;  %v106_v22 = vld [vmem:[%s479_s3 + $0x38] sm:$0xff]  ;;  %vm178_vm2 = vcmask 261120   ;;  %s241_s20 = sshll.u32 %s485_s9, 4  ;;  %vm232_vm6 = vcmask 57344   ;;  %s242_s20 = int_to_ptr.hbm [resolvable:$true] %s241_s20 }
   0xf   :  { %250 = vmatmul.msk.f32.vlgmr.msra.gmra.mxu0 %vm54_vm0, %v35_v16  ;;  %251 = vmatmul.msk.f32.vlgmr.msra.gmra.mxu1 %vm54_vm0, %v35_v16  ;;  %v105_v23 = vld [vmem:[%s479_s3 + $0x30] sm:$0xff]  ;;  %v104_v24 = vld [vmem:[%s479_s3 + $0x28] sm:$0xff]  ;;  %v103_v25 = vld [vmem:[%s479_s3 + $0x20] sm:$0xff] }
  0x10   :  { %123 = vmatpush.msra.mxu2 %v110_v18  ;;  %v102_v26 = vld [vmem:[%s479_s3 + $0x18] sm:$0xff]  ;;  %v101_v27 = vld [vmem:[%s479_s3 + $0x10] sm:$0xff]  ;;  %v100_v28 = vld [vmem:[%s479_s3 + $0x8] sm:$0xff]  ;;  %258 = vset.pattern.permute.xlu0 %v295_v51 }
  0x11   :  { %v99_v29 = vld [vmem:[%s479_s3] sm:$0xff]  ;;  %v147_v30 = vld [vmem:[%s481_s5 + $0x38] sm:$0xff]  ;;  %v146_v31 = vld [vmem:[%s481_s5 + $0x30] sm:$0xff] }
  0x12   :  { %124 = vmatpush.msra.mxu2 %v109_v19  ;;  %164 = vmatpush.msra.mxu3 %v147_v30  ;;  %v145_v32 = vld [vmem:[%s481_s5 + $0x28] sm:$0xff]  ;;  %v48_v33 = vld [vmem:[%s478_s2] sm:$0x3]  ;;  %v143_v42 = vld [vmem:[%s481_s5 + $0x18] sm:$0xff] }
  0x13   :  { %v50_v34 = vperm.slane %v48_v33, 0  ;;  %v51_v35 = vperm.slane %v48_v33, 1  ;;  %v144_v41 = vld [vmem:[%s481_s5 + $0x20] sm:$0xff]  ;;  %v142_v43 = vld [vmem:[%s481_s5 + $0x10] sm:$0xff]  ;;  %v141_v44 = vld [vmem:[%s481_s5 + $0x8] sm:$0xff] }
  0x14   :  { %125 = vmatpush.msra.mxu2 %v108_v20  ;;  %165 = vmatpush.msra.mxu3 %v146_v31  ;;  %v140_v45 = vld [vmem:[%s481_s5] sm:$0xff] }
  0x15   :  { %v259_v46 = vld [vmem:[%s480_s4] ss:$0 sm:$0xff] }
  0x16   :  { %126 = vmatpush.msra.mxu2 %v107_v21  ;;  %166 = vmatpush.msra.mxu3 %v145_v32  ;;  %v205_v50 = vld [vmem:[#allocation2] sm:$0x1] }
  0x17   :  { %208 = vperm.xlu0 %258, %v205_v50   ;;  %v260_v52 = vld [vmem:[%s482_s6] ss:$0 sm:$0xff]  ;;  %s296_s6 = smov [#allocation3]  }
  0x18   :  { %127 = vmatpush.msra.mxu2 %v106_v22  ;;  %167 = vmatpush.msra.mxu3 %v144_v41  ;;  %v177_v56 = vld [vmem:[%s483_s7] sm:$0xff]  ;;  %s239_s8 = sshll.u32 %s296_s6, 4  ;;  %s240_s8 = int_to_ptr.vmem [resolvable:$true] %s239_s8 }
  0x1a   :  { %128 = vmatpush.msra.mxu2 %v105_v23  ;;  %168 = vmatpush.msra.mxu3 %v143_v42 }
  0x1c   :  { %129 = vmatpush.msra.mxu2 %v104_v24  ;;  %169 = vmatpush.msra.mxu3 %v142_v43 }
  0x1e   :  { %130 = vmatpush.msra.mxu2 %v103_v25  ;;  %170 = vmatpush.msra.mxu3 %v141_v44 }
  0x20   :  { %131 = vmatpush.msra.mxu2 %v102_v26  ;;  %171 = vmatpush.msra.mxu3 %v140_v45 }
  0x22   :  { %132 = vmatpush.msra.mxu2 %v101_v27 }
  0x24   :  { %133 = vmatpush.msra.mxu2 %v100_v28 }
  0x26   :  { %134 = vmatpush.msra.mxu2 %v99_v29 }
  0x89   :  { %v209_v57 = vpop.permute.xlu0 %208 }
  0x8a   :  { %v211_v58 = vperm.slane %v209_v57, 0 }
  0x8c   :  { %v75_v36 = vpop.f32.mrf.mxu0  ;;  %v95_v37 = vpop.f32.mrf.mxu1 }
  0x8d   :  { %v76_v38 = vadd.f32 %v75_v36, %v50_v34  ;;  %v96_v39 = vadd.f32 %v95_v37, %v51_v35 }
  0x8f   :  { %v98_v40 = vmul.f32 %v96_v39, %v76_v38 }
  0x91   :  { %135 = vmatmul.f32.vlgmr.msra.gmra.mxu2 %v98_v40 }
 0x114   :  { %v136_v47 = vpop.f32.mrf.mxu2 }
 0x115   :  { %v137_v48 = vadd.f32 %v259_v46, %v136_v47 }
 0x117   :  { %261 = vtanh.f32 %v137_v48 }
 0x11d   :  { %v262_v49 = vpop.eup %261 }
 0x11e   :  { %252 = vmatmul.msk.f32.vlgmr.msra.gmra.mxu3 %vm152_vm1, %v262_v49 }
 0x1a1   :  { %v173_v53 = vpop.f32.mrf.mxu3 }
 0x1a2   :  { %v174_v54 = vadd.f32 %v260_v52, %v173_v53 }
 0x1a4   :  { %263 = vtanh.f32 %v174_v54 }
 0x1aa   :  { %v264_v55 = vpop.eup %263 }
 0x1ab   :  { %253 = vmatpush.xpose.msk.msrb.mxu0 %vm178_vm2, %v264_v55 }
 0x1ae   :  { %254 = vmatmul.msk.f32.vlgmr.msrb.gmra.mxu0 %vm178_vm2, %v177_v56 }
 0x22b   :  { %v202_v59 = vpop.f32.mrf.mxu0 }
 0x22c   :  { %v212_v60 = vadd.f32 %v211_v58, %v202_v59 }
 0x22e   :  { %v255_v61 = vmul.f32 -1.442695, %v212_v60 }
 0x230   :  { %265 = vpow2.f32 %v255_v61 }
 0x236   :  { %v266_v62 = vpop.eup %265 }
 0x237   :  { %v216_v63 = vadd.f32 1.0, %v266_v62 }
 0x239   :  { %267 = vrcp.f32 %v216_v63  ;;  %v228_v3 = vand.u32 2147483648, %v216_v63  ;;  %v226_v5 = vand.u32 2147483647, %v216_v63  ;;  %vm222_vm4 = vweird.f32 %v216_v63 }
 0x23b   :  { %v229_v7 = vor.u32 1.1754944e-38, %v228_v3  ;;  %vm227_vm7 = vcmp.eq.f32.partialorder %v226_v5, 8.507059e+37 }
 0x23f   :  { %v268_v0 = vpop.eup %267 }
 0x240   :  { %v218_v1 = vmul.f32 %v268_v0, %v216_v63  ;;  %vm223_vm3 = vweird.f32 %v268_v0 }
 0x241   :  { %vm224_vm5 = vmor %vm222_vm4, %vm223_vm3 }
 0x242   :  { %v219_v2 = vsub.f32 1.0, %v218_v1 }
 0x244   :  { %v220_v4 = vmul.f32 %v268_v0, %v219_v2 }
 0x246   :  { %v221_v6 = vadd.f32 %v268_v0, %v220_v4 }
 0x248   :  { %v225_v8 = vsel %vm224_vm5, %v268_v0, %v221_v6 }
 0x249   :  { %v230_v9 = vsel %vm227_vm7, %v229_v7, %v225_v8 }
 0x24a   :  { %233 = vst.msk [vmem:[#allocation3] sm:$0x1] %vm232_vm6, %v230_v9 }
 0x24b   :  { %244 = dma.vmem_to_hbm [thread:$0]  %s240_s8, 16, %s242_s20, [#allocation4]  }
 0x24c   :  { %293 = dma.done.wait [#allocation4], 16  }
 0x24d   :  { %294 = vsyncadd [#allocation4], 4294967280 }
 0x24e   :  { %249 = vsyncpa [#allocation4], 1 }

</bundles_post_ra>
